<compile_context>
chip_gen: v7x
topology: tpu7x:2x2x1
jax: 0.10.0
libtpu: 0.0.40
codegen_flags: <defaults>
</compile_context>

<pallas_src>
import functools
import math

import jax
import jax.numpy as jnp
from jax.experimental import pallas as pl
from jax.experimental.pallas import tpu as pltpu


def vae_kernel(
    s_ref, a_ref, noise_ref,
    e1_ws, e1_wa, e2_w, mls_w, d1_w, d2_w, d3_w,
    bias_ref,
    out_ref,
    *, state_dim, action_dim, latent_dim, hidden,
):
    sa_dim = state_dim + action_dim
    b = bias_ref[...]                                   # [6, max_out], f32

    xs = s_ref[...].astype(jnp.float32)                 # [TB, state_dim]
    xa = a_ref[...].astype(jnp.float32)                 # [TB, action_dim]

    def dot(x, w_ref):
        return jnp.dot(x, w_ref[...], preferred_element_type=jnp.float32)

    # ---- encoder: relu(e1(cat(s, a))) without materializing the concat ----
    z = dot(xs, e1_ws) + dot(xa, e1_wa) + b[0:1, :hidden]
    z = jnp.maximum(z, 0.0)
    z = jnp.maximum(dot(z, e2_w) + b[1:2, :hidden], 0.0)

    # ---- fused mean / log_std head (one matmul, static lane-split) ----
    ml = dot(z, mls_w) + b[2:3, : 2 * latent_dim]       # [TB, 2*latent]
    mean = ml[:, :latent_dim]
    log_std = jnp.clip(ml[:, latent_dim:], -4.0, 15.0)
    std = jnp.exp(log_std)

    # ---- reparameterization: z = mean + std * eps ----
    zl = mean + std * noise_ref[...].astype(jnp.float32)

    # ---- decoder ----
    h = jnp.maximum(dot(zl, d1_w) + b[3:4, :hidden], 0.0)
    h = jnp.maximum(dot(h, d2_w) + b[4:5, :hidden], 0.0)
    u = dot(h, d3_w) + b[5:6, :sa_dim]

    # single lane-contiguous output slab: [u | mean | std]
    out_ref[...] = jnp.concatenate([u, mean, std], axis=1)


def make_params(key, state_dim, action_dim, latent_dim, hidden):
    """Deterministic PyTorch-style init (weights stored [in, out], biases [1, out])."""
    in_dim = state_dim + action_dim
    dims = {
        "e1": (in_dim, hidden),
        "e2": (hidden, hidden),
        "mean": (hidden, latent_dim),
        "ls": (hidden, latent_dim),
        "d1": (latent_dim, hidden),
        "d2": (hidden, hidden),
        "d3": (hidden, in_dim),
    }
    params = {}
    keys = jax.random.split(key, 2 * len(dims))
    for i, (name, (fi, fo)) in enumerate(dims.items()):
        bound = 1.0 / math.sqrt(fi)
        params[f"{name}_w"] = jax.random.uniform(
            keys[2 * i], (fi, fo), jnp.float32, -bound, bound)
        params[f"{name}_b"] = jax.random.uniform(
            keys[2 * i + 1], (1, fo), jnp.float32, -bound, bound)
    return params


def vae_forward(state, action, noise, params, *, block_b=512):
    state = state.astype(jnp.float32)
    action = action.astype(jnp.float32)
    noise = noise.astype(jnp.float32)

    B, state_dim = state.shape
    action_dim = action.shape[1]
    sa_dim = state_dim + action_dim
    hidden = params["e1_w"].shape[1]
    latent_dim = params["mean_w"].shape[1]
    out_width = sa_dim + 2 * latent_dim

    # Split e1 weight rows -> no HBM concat([state, action]) needed.
    e1_ws = params["e1_w"][:state_dim]
    e1_wa = params["e1_w"][state_dim:]
    # Fuse mean / log_std heads into a single [hidden, 2*latent] matmul.
    mls_w = jnp.concatenate([params["mean_w"], params["ls_w"]], axis=1)
    mls_b = jnp.concatenate([params["mean_b"], params["ls_b"]], axis=1)

    # Pack all 6 biases into one [6, max_out] buffer (zero-padded rows).
    bias_list = [params["e1_b"], params["e2_b"], mls_b,
                 params["d1_b"], params["d2_b"], params["d3_b"]]
    max_out = max(int(b_.shape[1]) for b_ in bias_list)
    bias_pack = jnp.stack(
        [jnp.pad(b_[0], (0, max_out - b_.shape[1])) for b_ in bias_list])

    weights = [e1_ws, e1_wa, params["e2_w"], mls_w,
               params["d1_w"], params["d2_w"], params["d3_w"]]

    # Batch tile: full batch if it fits one block, otherwise a multiple of 8.
    if B <= block_b:
        TB = B
    else:
        TB = max(8, (block_b // 8) * 8)
    grid = (pl.cdiv(B, TB),)

    def batch_spec(feat):
        return pl.BlockSpec((TB, feat), lambda i: (i, 0))

    def resident_spec(arr):
        # Same block every grid step -> fetched once, stays VMEM-resident.
        return pl.BlockSpec(arr.shape, lambda i: (0, 0))

    in_specs = (
        [batch_spec(state_dim), batch_spec(action_dim), batch_spec(latent_dim)]
        + [resident_spec(w) for w in weights]
        + [resident_spec(bias_pack)]
    )
    out_specs = pl.BlockSpec((TB, out_width), lambda i: (i, 0))

    kernel = functools.partial(
        vae_kernel,
        state_dim=state_dim, action_dim=action_dim,
        latent_dim=latent_dim, hidden=hidden,
    )

    out = pl.pallas_call(
        kernel,
        out_shape=jax.ShapeDtypeStruct((B, out_width), jnp.float32),
        grid=grid,
        in_specs=in_specs,
        out_specs=out_specs,
        compiler_params=pltpu.CompilerParams(
            dimension_semantics=("parallel",)),
    )(state, action, noise, *weights, bias_pack)

    u = out[:, :sa_dim]
    mean = out[:, sa_dim:sa_dim + latent_dim]
    std = out[:, sa_dim + latent_dim:]
    return u, mean, std


def vae_forward_ref(state, action, noise, params):
    """Pure-JAX reference for correctness checking."""
    x = jnp.concatenate([state, action], axis=1).astype(jnp.float32)

    def lin(h, name):
        return h @ params[f"{name}_w"] + params[f"{name}_b"]

    z = jax.nn.relu(lin(x, "e1"))
    z = jax.nn.relu(lin(z, "e2"))
    mean = lin(z, "mean")
    std = jnp.exp(jnp.clip(lin(z, "ls"), -4.0, 15.0))
    zl = mean + std * noise
    a = jax.nn.relu(lin(zl, "d1"))
    a = jax.nn.relu(lin(a, "d2"))
    u = lin(a, "d3")
    return u, mean, std


if __name__ == "__main__":
    # Small shapes consistent with the module's forward; B > TB so the
    # batch-tiled grid (2 steps) is actually exercised.
    B, state_dim, action_dim, latent_dim, hidden = 64, 12, 4, 8, 32

    key = jax.random.PRNGKey(0)
    k_params, k_state, k_action, k_noise = jax.random.split(key, 4)

    params = make_params(k_params, state_dim, action_dim, latent_dim, hidden)
    state = jax.random.normal(k_state, (B, state_dim), jnp.float32)
    action = jax.random.normal(k_action, (B, action_dim), jnp.float32)
    # torch.randn_like(std) equivalent, generated deterministically outside.
    noise = jax.random.normal(k_noise, (B, latent_dim), jnp.float32)

    u, mean, std = jax.block_until_ready(
        vae_forward(state, action, noise, params, block_b=32))
    u_r, mean_r, std_r = vae_forward_ref(state, action, noise, params)

    assert u.shape == (B, state_dim + action_dim)
    assert mean.shape == (B, latent_dim) and std.shape == (B, latent_dim)
    assert jnp.allclose(u, u_r, rtol=1e-2, atol=1e-2)
    assert jnp.allclose(mean, mean_r, rtol=1e-2, atol=1e-2)
    assert jnp.allclose(std, std_r, rtol=1e-2, atol=1e-2)

    print("KERNEL_OK")
</pallas_src>

<mosaic_0001>
module attributes {stable_mosaic.version = 11 : i64} {
  func.func @vae_kernel(%arg0: i32, %arg1: memref<32x12xf32, #tpu.memory_space<vmem>>, %arg2: memref<32x4xf32, #tpu.memory_space<vmem>>, %arg3: memref<32x8xf32, #tpu.memory_space<vmem>>, %arg4: memref<12x32xf32, #tpu.memory_space<vmem>>, %arg5: memref<4x32xf32, #tpu.memory_space<vmem>>, %arg6: memref<32x32xf32, #tpu.memory_space<vmem>>, %arg7: memref<32x16xf32, #tpu.memory_space<vmem>>, %arg8: memref<8x32xf32, #tpu.memory_space<vmem>>, %arg9: memref<32x32xf32, #tpu.memory_space<vmem>>, %arg10: memref<32x16xf32, #tpu.memory_space<vmem>>, %arg11: memref<6x32xf32, #tpu.memory_space<vmem>>, %arg12: memref<32x32xf32, #tpu.memory_space<vmem>>) attributes {dimension_semantics = [#tpu.dimension_semantics<parallel>], iteration_bounds = array<i64: 2>, scalar_prefetch = 0 : i64, scratch_operands = 0 : i64, tpu.core_type = #tpu.core_type<tc>, window_params = [{transform_indices = @transform_0, window_bounds = array<i64: 32, 12>}, {transform_indices = @transform_1, window_bounds = array<i64: 32, 4>}, {transform_indices = @transform_2, window_bounds = array<i64: 32, 8>}, {pipeline_mode = #tpu.pipeline_mode<synchronous>, transform_indices = @transform_3, window_bounds = array<i64: 12, 32>}, {pipeline_mode = #tpu.pipeline_mode<synchronous>, transform_indices = @transform_4, window_bounds = array<i64: 4, 32>}, {pipeline_mode = #tpu.pipeline_mode<synchronous>, transform_indices = @transform_5, window_bounds = array<i64: 32, 32>}, {pipeline_mode = #tpu.pipeline_mode<synchronous>, transform_indices = @transform_6, window_bounds = array<i64: 32, 16>}, {pipeline_mode = #tpu.pipeline_mode<synchronous>, transform_indices = @transform_7, window_bounds = array<i64: 8, 32>}, {pipeline_mode = #tpu.pipeline_mode<synchronous>, transform_indices = @transform_8, window_bounds = array<i64: 32, 32>}, {pipeline_mode = #tpu.pipeline_mode<synchronous>, transform_indices = @transform_9, window_bounds = array<i64: 32, 16>}, {pipeline_mode = #tpu.pipeline_mode<synchronous>, transform_indices = @transform_10, window_bounds = array<i64: 6, 32>}, {transform_indices = @transform_11, window_bounds = array<i64: 32, 32>}]} {
    %c0 = arith.constant 0 : index
    %c0_0 = arith.constant 0 : index
    %0 = vector.load %arg11[%c0, %c0_0] : memref<6x32xf32, #tpu.memory_space<vmem>>, vector<6x32xf32>
    %c0_1 = arith.constant 0 : index
    %c0_2 = arith.constant 0 : index
    %1 = vector.load %arg1[%c0_1, %c0_2] : memref<32x12xf32, #tpu.memory_space<vmem>>, vector<32x12xf32>
    %c0_3 = arith.constant 0 : index
    %c0_4 = arith.constant 0 : index
    %2 = vector.load %arg2[%c0_3, %c0_4] : memref<32x4xf32, #tpu.memory_space<vmem>>, vector<32x4xf32>
    %c0_5 = arith.constant 0 : index
    %c0_6 = arith.constant 0 : index
    %3 = vector.load %arg4[%c0_5, %c0_6] : memref<12x32xf32, #tpu.memory_space<vmem>>, vector<12x32xf32>
    %cst = arith.constant dense<0.000000e+00> : vector<32x32xf32>
    %4 = tpu.matmul %1, %3, %cst {dimension_numbers = #tpu.dot_dimension_numbers<[1], [0], [0], [1], [0, 0, 1, 1], [], []>} : vector<32x12xf32>, vector<12x32xf32>, vector<32x32xf32> -> vector<32x32xf32>
    %c0_7 = arith.constant 0 : index
    %c0_8 = arith.constant 0 : index
    %5 = vector.load %arg5[%c0_7, %c0_8] : memref<4x32xf32, #tpu.memory_space<vmem>>, vector<4x32xf32>
    %cst_9 = arith.constant dense<0.000000e+00> : vector<32x32xf32>
    %6 = tpu.matmul %2, %5, %cst_9 {dimension_numbers = #tpu.dot_dimension_numbers<[1], [0], [0], [1], [0, 0, 1, 1], [], []>} : vector<32x4xf32>, vector<4x32xf32>, vector<32x32xf32> -> vector<32x32xf32>
    %7 = arith.addf %4, %6 : vector<32x32xf32>
    %8 = vector.extract_strided_slice %0 {offsets = [0, 0], sizes = [1, 32], strides = [1, 1]} : vector<6x32xf32> to vector<1x32xf32>
    %9 = vector.broadcast %8 : vector<1x32xf32> to vector<32x32xf32>
    %10 = arith.addf %7, %9 : vector<32x32xf32>
    %cst_10 = arith.constant 0.000000e+00 : f32
    %11 = vector.broadcast %cst_10 : f32 to vector<32x32xf32>
    %12 = arith.maximumf %10, %11 : vector<32x32xf32>
    %c0_11 = arith.constant 0 : index
    %c0_12 = arith.constant 0 : index
    %13 = vector.load %arg6[%c0_11, %c0_12] : memref<32x32xf32, #tpu.memory_space<vmem>>, vector<32x32xf32>
    %cst_13 = arith.constant dense<0.000000e+00> : vector<32x32xf32>
    %14 = tpu.matmul %12, %13, %cst_13 {dimension_numbers = #tpu.dot_dimension_numbers<[1], [0], [0], [1], [0, 0, 1, 1], [], []>} : vector<32x32xf32>, vector<32x32xf32>, vector<32x32xf32> -> vector<32x32xf32>
    %15 = vector.extract_strided_slice %0 {offsets = [1, 0], sizes = [1, 32], strides = [1, 1]} : vector<6x32xf32> to vector<1x32xf32>
    %16 = vector.broadcast %15 : vector<1x32xf32> to vector<32x32xf32>
    %17 = arith.addf %14, %16 : vector<32x32xf32>
    %cst_14 = arith.constant 0.000000e+00 : f32
    %18 = vector.broadcast %cst_14 : f32 to vector<32x32xf32>
    %19 = arith.maximumf %17, %18 : vector<32x32xf32>
    %c0_15 = arith.constant 0 : index
    %c0_16 = arith.constant 0 : index
    %20 = vector.load %arg7[%c0_15, %c0_16] : memref<32x16xf32, #tpu.memory_space<vmem>>, vector<32x16xf32>
    %cst_17 = arith.constant dense<0.000000e+00> : vector<32x16xf32>
    %21 = tpu.matmul %19, %20, %cst_17 {dimension_numbers = #tpu.dot_dimension_numbers<[1], [0], [0], [1], [0, 0, 1, 1], [], []>} : vector<32x32xf32>, vector<32x16xf32>, vector<32x16xf32> -> vector<32x16xf32>
    %22 = vector.extract_strided_slice %0 {offsets = [2, 0], sizes = [1, 16], strides = [1, 1]} : vector<6x32xf32> to vector<1x16xf32>
    %23 = vector.broadcast %22 : vector<1x16xf32> to vector<32x16xf32>
    %24 = arith.addf %21, %23 : vector<32x16xf32>
    %25 = vector.extract_strided_slice %24 {offsets = [0, 0], sizes = [32, 8], strides = [1, 1]} : vector<32x16xf32> to vector<32x8xf32>
    %26 = vector.extract_strided_slice %24 {offsets = [0, 8], sizes = [32, 8], strides = [1, 1]} : vector<32x16xf32> to vector<32x8xf32>
    %cst_18 = arith.constant -4.000000e+00 : f32
    %cst_19 = arith.constant 1.500000e+01 : f32
    %27 = vector.broadcast %cst_18 : f32 to vector<32x8xf32>
    %28 = arith.maximumf %27, %26 : vector<32x8xf32>
    %29 = vector.broadcast %cst_19 : f32 to vector<32x8xf32>
    %30 = arith.minimumf %29, %28 : vector<32x8xf32>
    %31 = math.exp %30 : vector<32x8xf32>
    %c0_20 = arith.constant 0 : index
    %c0_21 = arith.constant 0 : index
    %32 = vector.load %arg3[%c0_20, %c0_21] : memref<32x8xf32, #tpu.memory_space<vmem>>, vector<32x8xf32>
    %33 = arith.mulf %31, %32 : vector<32x8xf32>
    %34 = arith.addf %25, %33 : vector<32x8xf32>
    %c0_22 = arith.constant 0 : index
    %c0_23 = arith.constant 0 : index
    %35 = vector.load %arg8[%c0_22, %c0_23] : memref<8x32xf32, #tpu.memory_space<vmem>>, vector<8x32xf32>
    %cst_24 = arith.constant dense<0.000000e+00> : vector<32x32xf32>
    %36 = tpu.matmul %34, %35, %cst_24 {dimension_numbers = #tpu.dot_dimension_numbers<[1], [0], [0], [1], [0, 0, 1, 1], [], []>} : vector<32x8xf32>, vector<8x32xf32>, vector<32x32xf32> -> vector<32x32xf32>
    %37 = vector.extract_strided_slice %0 {offsets = [3, 0], sizes = [1, 32], strides = [1, 1]} : vector<6x32xf32> to vector<1x32xf32>
    %38 = vector.broadcast %37 : vector<1x32xf32> to vector<32x32xf32>
    %39 = arith.addf %36, %38 : vector<32x32xf32>
    %cst_25 = arith.constant 0.000000e+00 : f32
    %40 = vector.broadcast %cst_25 : f32 to vector<32x32xf32>
    %41 = arith.maximumf %39, %40 : vector<32x32xf32>
    %c0_26 = arith.constant 0 : index
    %c0_27 = arith.constant 0 : index
    %42 = vector.load %arg9[%c0_26, %c0_27] : memref<32x32xf32, #tpu.memory_space<vmem>>, vector<32x32xf32>
    %cst_28 = arith.constant dense<0.000000e+00> : vector<32x32xf32>
    %43 = tpu.matmul %41, %42, %cst_28 {dimension_numbers = #tpu.dot_dimension_numbers<[1], [0], [0], [1], [0, 0, 1, 1], [], []>} : vector<32x32xf32>, vector<32x32xf32>, vector<32x32xf32> -> vector<32x32xf32>
    %44 = vector.extract_strided_slice %0 {offsets = [4, 0], sizes = [1, 32], strides = [1, 1]} : vector<6x32xf32> to vector<1x32xf32>
    %45 = vector.broadcast %44 : vector<1x32xf32> to vector<32x32xf32>
    %46 = arith.addf %43, %45 : vector<32x32xf32>
    %cst_29 = arith.constant 0.000000e+00 : f32
    %47 = vector.broadcast %cst_29 : f32 to vector<32x32xf32>
    %48 = arith.maximumf %46, %47 : vector<32x32xf32>
    %c0_30 = arith.constant 0 : index
    %c0_31 = arith.constant 0 : index
    %49 = vector.load %arg10[%c0_30, %c0_31] : memref<32x16xf32, #tpu.memory_space<vmem>>, vector<32x16xf32>
    %cst_32 = arith.constant dense<0.000000e+00> : vector<32x16xf32>
    %50 = tpu.matmul %48, %49, %cst_32 {dimension_numbers = #tpu.dot_dimension_numbers<[1], [0], [0], [1], [0, 0, 1, 1], [], []>} : vector<32x32xf32>, vector<32x16xf32>, vector<32x16xf32> -> vector<32x16xf32>
    %51 = vector.extract_strided_slice %0 {offsets = [5, 0], sizes = [1, 16], strides = [1, 1]} : vector<6x32xf32> to vector<1x16xf32>
    %52 = vector.broadcast %51 : vector<1x16xf32> to vector<32x16xf32>
    %53 = arith.addf %50, %52 : vector<32x16xf32>
    %54 = tpu.concatenate %53, %25, %31 in 1 : vector<32x16xf32>, vector<32x8xf32>, vector<32x8xf32> -> vector<32x32xf32>
    %c0_33 = arith.constant 0 : index
    %c0_34 = arith.constant 0 : index
    %55 = vector.load %arg12[%c0_33, %c0_34] : memref<32x32xf32, #tpu.memory_space<vmem>>, vector<32x32xf32>
    tpu.vector_store %arg12[%c0_33, %c0_34], %54 {strides = array<i32>} : memref<32x32xf32, #tpu.memory_space<vmem>>, vector<32x32xf32>,
    return
  }
  func.func @transform_0(%arg0: i32) -> (i32, i32) {
    %c0_i32 = arith.constant 0 : i32
    %c0_i32_0 = arith.constant 0 : i32
    return %arg0, %c0_i32 : i32, i32
  }
  func.func @transform_1(%arg0: i32) -> (i32, i32) {
    %c0_i32 = arith.constant 0 : i32
    %c0_i32_0 = arith.constant 0 : i32
    return %arg0, %c0_i32 : i32, i32
  }
  func.func @transform_2(%arg0: i32) -> (i32, i32) {
    %c0_i32 = arith.constant 0 : i32
    %c0_i32_0 = arith.constant 0 : i32
    return %arg0, %c0_i32 : i32, i32
  }
  func.func @transform_3(%arg0: i32) -> (i32, i32) {
    %c0_i32 = arith.constant 0 : i32
    %c0_i32_0 = arith.constant 0 : i32
    %c0_i32_1 = arith.constant 0 : i32
    return %c0_i32, %c0_i32_0 : i32, i32
  }
  func.func @transform_4(%arg0: i32) -> (i32, i32) {
    %c0_i32 = arith.constant 0 : i32
    %c0_i32_0 = arith.constant 0 : i32
    %c0_i32_1 = arith.constant 0 : i32
    return %c0_i32, %c0_i32_0 : i32, i32
  }
  func.func @transform_5(%arg0: i32) -> (i32, i32) {
    %c0_i32 = arith.constant 0 : i32
    %c0_i32_0 = arith.constant 0 : i32
    %c0_i32_1 = arith.constant 0 : i32
    return %c0_i32, %c0_i32_0 : i32, i32
  }
  func.func @transform_6(%arg0: i32) -> (i32, i32) {
    %c0_i32 = arith.constant 0 : i32
    %c0_i32_0 = arith.constant 0 : i32
    %c0_i32_1 = arith.constant 0 : i32
    return %c0_i32, %c0_i32_0 : i32, i32
  }
  func.func @transform_7(%arg0: i32) -> (i32, i32) {
    %c0_i32 = arith.constant 0 : i32
    %c0_i32_0 = arith.constant 0 : i32
    %c0_i32_1 = arith.constant 0 : i32
    return %c0_i32, %c0_i32_0 : i32, i32
  }
  func.func @transform_8(%arg0: i32) -> (i32, i32) {
    %c0_i32 = arith.constant 0 : i32
    %c0_i32_0 = arith.constant 0 : i32
    %c0_i32_1 = arith.constant 0 : i32
    return %c0_i32, %c0_i32_0 : i32, i32
  }
  func.func @transform_9(%arg0: i32) -> (i32, i32) {
    %c0_i32 = arith.constant 0 : i32
    %c0_i32_0 = arith.constant 0 : i32
    %c0_i32_1 = arith.constant 0 : i32
    return %c0_i32, %c0_i32_0 : i32, i32
  }
  func.func @transform_10(%arg0: i32) -> (i32, i32) {
    %c0_i32 = arith.constant 0 : i32
    %c0_i32_0 = arith.constant 0 : i32
    %c0_i32_1 = arith.constant 0 : i32
    return %c0_i32, %c0_i32_0 : i32, i32
  }
  func.func @transform_11(%arg0: i32) -> (i32, i32) {
    %c0_i32 = arith.constant 0 : i32
    %c0_i32_0 = arith.constant 0 : i32
    return %arg0, %c0_i32 : i32, i32
  }
}

</mosaic_0001>

<bundles_post_ra>
// kernel: tpu_custom_call.1
= control target key start
LH: loop header
LB: loop body
LE: loop exit
PB: predicated region body
PF: predicated region fallthrough
CT: control target
= control target key end

     0   :  { %s1692_s17 = smov 0   ;;  %s1836_s0 = inlined_call_operand.vmem [shape: f32[64,12], index: 0, kind: input, shape index: {}]   ;;  %s1837_s1 = inlined_call_operand.vmem [shape: f32[64,4], index: 1, kind: input, shape index: {}]   ;;  %s1838_s2 = inlined_call_operand.vmem [shape: f32[64,8], index: 2, kind: input, shape index: {}]   ;;  %s1839_s3 = inlined_call_operand.vmem [shape: f32[12,32], index: 3, kind: input, shape index: {}]   ;;  %s1840_s4 = inlined_call_operand.vmem [shape: f32[4,32], index: 4, kind: input, shape index: {}]   ;;  %s1841_s5 = inlined_call_operand.vmem [shape: f32[32,32], index: 5, kind: input, shape index: {}]   ;;  %s1842_s6 = inlined_call_operand.vmem [shape: f32[32,16], index: 6, kind: input, shape index: {}]   ;;  %s1843_s7 = inlined_call_operand.vmem [shape: f32[8,32], index: 7, kind: input, shape index: {}]   ;;  %s1844_s8 = inlined_call_operand.vmem [shape: f32[32,32], index: 8, kind: input, shape index: {}]   ;;  %s1845_s9 = inlined_call_operand.vmem [shape: f32[32,16], index: 9, kind: input, shape index: {}]   ;;  %s1846_s10 = inlined_call_operand.vmem [shape: f32[6,32], index: 10, kind: input, shape index: {}]   ;;  %s1847_s11 = inlined_call_operand.vmem [shape: f32[64,32], index: 11, kind: output, shape index: {}]  }
   0x1 LB: > { %s1383_s18 = sadd.s32 4294967295, %s1626_s17   ;;  %p1387_p0 = scmp.ge.s32.totalorder %s1626_s17, 1  ;;  %s1626_s17 = sphi %s1692_s17, %s21_s17  }
   0x2   : > { %p360_p1 = scmp.lt.s32.totalorder %s1626_s17, 3 }
   0x4   : > { %p361_p2 = pnand %p1387_p0, %p360_p1 }
   0x5   : > { %v445_v0 = vld [vmem:[%s1840_s4] sm:$0xf] (!%p361_p2)  ;;  %vm459_vm0 = vcmask (!%p361_p2), 1043456   ;;  %s1388_s21 = sshll.u32 (!%p361_p2), %s1383_s18, 2  ;;  %v444_v2 = vld [vmem:[%s1839_s3 + $0x8] sm:$0xf] (!%p361_p2)  ;;  %v649_v22 = vlaneseq (!%p361_p2) }
   0x6   : > { %364 = sbr.rel (%p361_p2) target bundleno = 1472 (0x5c0), region = 64  ;;  %v443_v1 = vld [vmem:[%s1839_s3] sm:$0xff] (!%p361_p2)  ;;  %1476 = vmatprep.subr.msk.mxu0 (!%p361_p2), %vm459_vm0, %v445_v0  ;;  %p411_p3 = scmp.lt.s32.totalorder (!%p361_p2), %s1388_s21, 7  ;;  %vm1628_vm1 = vmmov (!%p361_p2), 1   ;;  %v662_v6 = vld [vmem:[%s1841_s5 + $0x8] sm:$0xff] (!%p361_p2)  ;;  %vm446_vm3 = vcmask (!%p361_p2), 31744  }
   0x7   : > { %v661_v3 = vld [vmem:[%s1841_s5] sm:$0xff] (!%p361_p2)  ;;  %1477 = vmatpush3.msk.msra.mxu0 (!%p361_p2), %vm459_vm0, %v445_v0  ;;  %v1558_v4 = vpack.c.bf16 (!%p361_p2), %v444_v2, %v443_v1  ;;  %vm1712_vm2 = vmpackc.low (!%p361_p2), %vm459_vm0, %vm1628_vm1  ;;  %vm548_vm4 = vcmask (!%p361_p2), 97280   ;;  %v663_v16 = vld [vmem:[%s1841_s5 + $0x10] sm:$0xff] (!%p361_p2)  ;;  %v1745_v23 = vshrl.u32 (!%p361_p2), %v649_v22, 7  ;;  %vm669_vm5 = vcmask (!%p361_p2), 261120   ;;  %s1629_s19 = smov (!%p361_p2), 8  }
   0x8   : > { %v1564_v7 = vpack.c.bf16 (!%p361_p2), %v662_v6, %v661_v3  ;;  %v664_v17 = vld [vmem:[%s1841_s5 + $0x18] sm:$0xff] (!%p361_p2)  ;;  %v771_v19 = vld [vmem:[%s1842_s6] sm:$0xff] (!%p361_p2)  ;;  %v772_v20 = vld [vmem:[%s1842_s6 + $0x8] sm:$0xff] (!%p361_p2)  ;;  %s1630_s22 = smov (!%p361_p2), 120   ;;  %s1631_s27 = smov (!%p361_p2), 16   ;;  %vm941_vm6 = vcmask (!%p361_p2), 64512  }
   0x9   : > { %1560 = vmatprep.subr.msk.bf16.mxu0 (!%p361_p2), %vm1712_vm2, %v1558_v4  ;;  %v1568_v18 = vpack.c.bf16 (!%p361_p2), %v664_v17, %v663_v16  ;;  %v1572_v21 = vpack.c.bf16 (!%p361_p2), %v772_v20, %v771_v19  ;;  %v651_v24 = vsub.s32 (!%p361_p2), 0, %v1745_v23  ;;  %v1751_v25 = vld [vmem:[%s1846_s10] sm:$0x3f] (!%p361_p2)  ;;  %v773_v39 = vld [vmem:[%s1842_s6 + $0x10] sm:$0xff] (!%p361_p2)  ;;  %v774_v40 = vld [vmem:[%s1842_s6 + $0x18] sm:$0xff] (!%p361_p2)  ;;  %v667_v46 = vsub.s32 (!%p361_p2), 1, %v1745_v23 }
   0xa   : > { %1565 = vmatprep.subr.bf16.mxu1 (!%p361_p2), %v1564_v7  ;;  %v1576_v41 = vpack.c.bf16 (!%p361_p2), %v774_v40, %v773_v39  ;;  %v936_v60 = vld [vmem:[%s1843_s7] sm:$0xff] (!%p361_p2)  ;;  %v777_v61 = vsub.s32 (!%p361_p2), 2, %v1745_v23  ;;  %vm1289_vm7 = vcmask (!%p361_p2), 130048   ;;  %vm1294_vm8 = vcmask (!%p361_p2), 195584  }
   0xb   : > { %1567 = vmatpush3.bf16.msra.mxu1 (!%p361_p2), %v1564_v7  ;;  %v652_v26 = vrot.slane (!%p361_p2), %v1751_v25, %v651_v24  ;;  %v668_v47 = vrot.slane (!%p361_p2), %v1751_v25, %v667_v46 }
   0xc   : > { %1569 = vmatprep.subr.bf16.mxu1 (!%p361_p2), %v1568_v18  ;;  %v778_v62 = vrot.slane (!%p361_p2), %v1751_v25, %v777_v61 }
   0xd   : > { %s1851_s21 = smov (!%p411_p3, %s1388_s21), 7 }
   0xe   : > { %s1721_s30 = sshll.u32 %s1851_s21, 3 }
   0xf   : > { %s420_s14 = scalar_lea.vmem %s1837_s1, %s1721_s30  ;;  %s414_s18 = scalar_lea.vmem %s1836_s0, %s1721_s30  ;;  %1571 = vmatpush3.bf16.msra.mxu1 %v1568_v18 }
  0x10   : > { %v439_v8 = vld [vmem:[%s420_s14] sm:$0xff]  ;;  %v440_v9 = vld [vmem:[%s420_s14 + $0x8] sm:$0xff]  ;;  %v441_v10 = vld [vmem:[%s420_s14 + $0x10] sm:$0xff]  ;;  %1573 = vmatprep.subr.bf16.mxu1 %v1572_v21  ;;  %s432_s25 = scalar_lea.vmem %s1847_s11, %s1721_s30 }
  0x11   : > { %1478 = vmatprep.mubr.msk.f32.mxu0 %vm446_vm3, %v439_v8  ;;  %v442_v11 = vld [vmem:[%s420_s14 + $0x18] sm:$0xff]  ;;  %v435_v12 = vld [vmem:[%s414_s18] sm:$0xff]  ;;  %v436_v13 = vld [vmem:[%s414_s18 + $0x8] sm:$0xff] }
  0x12   : > { %1479 = vmatmul.mubr.msk.f32.vlgmr.msra.gmra.mrb[0].mxu0 %vm446_vm3, %v440_v9  ;;  %v437_v14 = vld [vmem:[%s414_s18 + $0x10] sm:$0xff]  ;;  %v438_v15 = vld [vmem:[%s414_s18 + $0x18] sm:$0xff]  ;;  %s426_s18 = scalar_lea.vmem %s1838_s2, %s1721_s30 }
  0x13   : > { %1563 = vmatpush3.bf16.msk.msra.mxu0 %vm1712_vm2, %v1558_v4  ;;  %1481 = vmatprep.mubr.msk.f32.mxu0 %vm446_vm3, %v441_v10  ;;  %v892_v42 = vld [vmem:[%s426_s18] sm:$0xff]  ;;  %v894_v43 = vld [vmem:[%s426_s18 + $0x10] sm:$0xff]  ;;  %v893_v44 = vld [vmem:[%s426_s18 + $0x8] sm:$0xff] }
  0x14   : > { %900 = vrot.lane.b32.xlu0 %v892_v42, %s1629_s19  ;;  %904 = vrot.lane.b32.xlu1 %v894_v43, %s1629_s19  ;;  %v895_v45 = vld [vmem:[%s426_s18 + $0x18] sm:$0xff] }
  0x15   : > { %1522 = vmatprep.subr.mxu0 %v936_v60 }
  0x16   : > { %1482 = vmatmul.mubr.msk.f32.gmra.mrb[2].mxu0 %vm446_vm3, %v442_v11 }
  0x17   : > { %1488 = vmatprep.mubr.msk.f32.mxu0 %vm548_vm4, %v435_v12 }
  0x18   : > { %902 = vrot.lane.b32.xlu0 %v893_v44, %s1629_s19  ;;  %906 = vrot.lane.b32.xlu1 %v895_v45, %s1629_s19  ;;  %v1045_v44 = vld [vmem:[%s1844_s8 + $0x10] sm:$0xff]  ;;  %v1046_v45 = vld [vmem:[%s1844_s8 + $0x18] sm:$0xff] }
  0x19   : > { %v1584_v46 = vpack.c.bf16 %v1046_v45, %v1045_v44 }
  0x1a   : > { %1489 = vmatmul.mubr.msk.f32.vlgmr.msra.gmra.mrb[0].mxu0 %vm548_vm4, %v436_v13 }
  0x1b   : > { %1491 = vmatprep.mubr.msk.f32.mxu0 %vm548_vm4, %v437_v14  ;;  %1523 = vmatpush3.msra.mxu0 %v936_v60 }
  0x1e   : > { %1492 = vmatmul.mubr.msk.f32.gmra.mrb[2].mxu0 %vm548_vm4, %v438_v15 }
  0x86   : > { %v901_v18 = vpop.permute.xlu0 %900  ;;  %v905_v20 = vpop.permute.xlu1 %904 }
  0xed   : > { %v1490_v27 = vpop.f32.mrb[0].mxu0 }
  0xee   : > { %v654_v28 = vadd.f32 %v1490_v27, %v652_v26  ;;  %v630_v29 = vpop.f32.mrb[1].mxu0 }
  0xef   : > { %v653_v30 = vadd.f32 %v652_v26, %v630_v29 }
  0xf0   : > { %v658_v33 = vmax.f32 %v654_v28, 0.0  ;;  %v907_v28 = vpop.permute.xlu1 %906 }
  0xf1   : > { %v657_v31 = vmax.f32 %v653_v30, 0.0  ;;  %v1493_v32 = vpop.f32.mrb[2].mxu0 }
  0xf2   : > { %v656_v34 = vadd.f32 %v1493_v32, %v652_v26  ;;  %v640_v35 = vpop.f32.mrb[3].mxu0 }
  0xf3   : > { %v655_v36 = vadd.f32 %v652_v26, %v640_v35  ;;  %1502 = vmatprep.mubr.msk.f32.mxu1 %vm669_vm5, %v657_v31 }
  0xf4   : > { %1503 = vmatmul.mubr.msk.f32.vlgmr.msra.gmra.mrb[0].mxu1 %vm669_vm5, %v658_v33  ;;  %v660_v38 = vmax.f32 %v656_v34, 0.0  ;;  %v1043_v33 = vld [vmem:[%s1844_s8] sm:$0xff]  ;;  %v1044_v34 = vld [vmem:[%s1844_s8 + $0x8] sm:$0xff] }
  0xf5   : > { %v659_v37 = vmax.f32 %v655_v36, 0.0  ;;  %1575 = vmatpush3.bf16.msra.mxu1 %v1572_v21  ;;  %v903_v21 = vpop.permute.xlu0 %902  ;;  %v1580_v35 = vpack.c.bf16 %v1044_v34, %v1043_v33 }
  0xf6   : > { %1577 = vmatprep.subr.bf16.mxu1 %v1576_v41 }
  0xf7   : > { %1505 = vmatprep.mubr.msk.f32.mxu1 %vm669_vm5, %v659_v37 }
  0xf8   : > { %1506 = vmatmul.mubr.msk.f32.gmra.mrb[2].mxu1 %vm669_vm5, %v660_v38 }
  0xf9   : > { %1579 = vmatpush3.bf16.msra.mxu1 %v1576_v41 }
  0xfa   : > { %1581 = vmatprep.subr.bf16.mxu1 %v1580_v35 }
 0x1c7   : > { %v1504_v48 = vpop.f32.mrb[0].mxu1 }
 0x1c8   : > { %v754_v49 = vadd.f32 %v1504_v48, %v668_v47  ;;  %v748_v50 = vpop.f32.mrb[1].mxu1  ;;  %v1153_v48 = vld [vmem:[%s1845_s9 + $0x8] sm:$0xff] }
 0x1c9   : > { %v749_v51 = vadd.f32 %v748_v50, %v668_v47  ;;  %v939_v50 = vsub.s32 3, %v1745_v23 }
 0x1ca   : > { %v768_v54 = vmax.f32 %v754_v49, 0.0 }
 0x1cb   : > { %v767_v52 = vmax.f32 %v749_v51, 0.0  ;;  %v1507_v53 = vpop.f32.mrb[2].mxu1  ;;  %v940_v51 = vrot.slane %v1751_v25, %v939_v50 }
 0x1cc   : > { %v764_v55 = vadd.f32 %v1507_v53, %v668_v47  ;;  %v758_v56 = vpop.f32.mrb[3].mxu1 }
 0x1cd   : > { %v759_v57 = vadd.f32 %v758_v56, %v668_v47  ;;  %1516 = vmatprep.mubr.msk.f32.mxu1 %vm669_vm5, %v767_v52  ;;  %v1152_v47 = vld [vmem:[%s1845_s9] sm:$0xff] }
 0x1ce   : > { %1517 = vmatmul.mubr.msk.f32.vlgmr.msra.gmra.mrb[4].mxu1 %vm669_vm5, %v768_v54  ;;  %v770_v59 = vmax.f32 %v764_v55, 0.0  ;;  %v1588_v49 = vpack.c.bf16 %v1153_v48, %v1152_v47 }
 0x1cf   : > { %v769_v58 = vmax.f32 %v759_v57, 0.0  ;;  %1583 = vmatpush3.bf16.msra.mxu1 %v1580_v35 }
 0x1d0   : > { %1585 = vmatprep.subr.bf16.mxu1 %v1584_v46  ;;  %1589 = vmatprep.subr.bf16.mxu0 %v1588_v49 }
 0x1d1   : > { %1519 = vmatprep.mubr.msk.f32.mxu1 %vm669_vm5, %v769_v58 }
 0x1d2   : > { %1520 = vmatmul.mubr.msk.f32.gmra.mrb[6].mxu1 %vm669_vm5, %v770_v59 }
 0x1d3   : > { %1587 = vmatpush3.bf16.msra.mxu1 %v1584_v46 }
 0x2a1   : > { %v1518_v63 = vpop.f32.mrb[4].mxu1 }
 0x2a2   : > { %v863_v0 = vadd.f32 %v1518_v63, %v778_v62  ;;  %v857_v1 = vpop.f32.mrb[5].mxu1 }
 0x2a3   : > { %v858_v2 = vadd.f32 %v857_v1, %v778_v62  ;;  %v1155_v1 = vld [vmem:[%s1845_s9 + $0x18] sm:$0xff] }
 0x2a4   : > { %v877_v3 = vmax.f32 %v863_v0, -4.0 }
 0x2a5   : > { %v876_v4 = vmax.f32 %v858_v2, -4.0  ;;  %v1521_v5 = vpop.f32.mrb[6].mxu1 }
 0x2a6   : > { %v881_v6 = vmin.f32 %v877_v3, 15.0  ;;  %v873_v7 = vadd.f32 %v1521_v5, %v778_v62  ;;  %v867_v8 = vpop.f32.mrb[7].mxu1  ;;  %v1049_v3 = vsub.s32 4, %v1745_v23 }
 0x2a7   : > { %v880_v9 = vmin.f32 %v876_v4, 15.0  ;;  %v868_v10 = vadd.f32 %v867_v8, %v778_v62 }
 0x2a8   : > { %v886_v11 = vmul.f32 1.442695, %v881_v6  ;;  %v879_v12 = vmax.f32 %v873_v7, -4.0  ;;  %v1050_v4 = vrot.slane %v1751_v25, %v1049_v3 }
 0x2a9   : > { %v884_v13 = vmul.f32 1.442695, %v880_v9  ;;  %v878_v14 = vmax.f32 %v868_v10, -4.0 }
 0x2aa   : > { %1612 = vpow2.f32 %v886_v11  ;;  %v883_v15 = vmin.f32 %v879_v12, 15.0 }
 0x2ab   : > { %1614 = vpow2.f32 %v884_v13  ;;  %v882_v16 = vmin.f32 %v878_v14, 15.0 }
 0x2ac   : > { %v890_v17 = vmul.f32 1.442695, %v883_v15 }
 0x2ad   : > { %v888_v19 = vmul.f32 1.442695, %v882_v16 }
 0x2ae   : > { %1616 = vpow2.f32 %v890_v17 }
 0x2af   : > { %1618 = vpow2.f32 %v888_v19  ;;  %v1158_v19 = vsub.s32 5, %v1745_v23 }
 0x2b4   : > { %v1613_v22 = vpop.eup %1612 }
 0x2b5   : > { %v1615_v24 = vpop.eup %1614  ;;  %v913_v26 = vmul.f32 %v1613_v22, %v903_v21 }
 0x2b6   : > { %v912_v27 = vmul.f32 %v1615_v24, %v901_v18 }
 0x2b7   : > { %922 = vrot.lane.b32.xlu1 %v913_v26, %s1630_s22 }
 0x2b8   : > { %v1617_v29 = vpop.eup %1616  ;;  %920 = vrot.lane.b32.xlu0 %v912_v27, %s1630_s22 }
 0x2b9   : > { %v1619_v30 = vpop.eup %1618  ;;  %v915_v31 = vmul.f32 %v1617_v29, %v907_v28 }
 0x2ba   : > { %v914_v32 = vmul.f32 %v1619_v30, %v905_v20 }
 0x2bb   : > { %926 = vrot.lane.b32.xlu1 %v915_v31, %s1630_s22 }
 0x2bc   : > { %924 = vrot.lane.b32.xlu0 %v914_v32, %s1630_s22 }
 0x2bf   : > { %1263 = vrot.lane.b32.xlu1 %v863_v0, %s1631_s27 }
 0x2c0   : > { %1261 = vrot.lane.b32.xlu0 %v858_v2, %s1631_s27 }
 0x2c3   : > { %1265 = vrot.lane.b32.xlu1 %v868_v10, %s1631_s27 }
 0x2c4   : > { %1277 = vrot.lane.b32.xlu0 %v1615_v24, %s1631_s27 }
 0x2c7   : > { %1267 = vrot.lane.b32.xlu1 %v873_v7, %s1631_s27 }
 0x2c8   : > { %1279 = vrot.lane.b32.xlu0 %v1613_v22, %s1631_s27  ;;  %v1159_v22 = vrot.slane %v1751_v25, %v1158_v19 }
 0x2cb   : > { %1283 = vrot.lane.b32.xlu1 %v1617_v29, %s1631_s27 }
 0x2cc   : > { %1281 = vrot.lane.b32.xlu0 %v1619_v30, %s1631_s27 }
 0x329   : > { %v923_v36 = vpop.permute.xlu1 %922 }
 0x32a   : > { %v921_v37 = vpop.permute.xlu0 %920  ;;  %v933_v39 = vadd.f32 %v923_v36, %v863_v0  ;;  %v1154_v0 = vld [vmem:[%s1845_s9 + $0x10] sm:$0xff] }
 0x32b   : > { %v932_v38 = vadd.f32 %v921_v37, %v858_v2  ;;  %v1592_v2 = vpack.c.bf16 %v1155_v1, %v1154_v0 }
 0x32d   : > { %1524 = vmatprep.mubr.msk.f32.mxu0 %vm941_vm6, %v932_v38  ;;  %v927_v40 = vpop.permute.xlu1 %926 }
 0x32e   : > { %1525 = vmatmul.mubr.msk.f32.vlgmr.msra.gmra.mrb[4].mxu0 %vm941_vm6, %v933_v39  ;;  %v925_v41 = vpop.permute.xlu0 %924  ;;  %v935_v43 = vadd.f32 %v927_v40, %v873_v7 }
 0x32f   : > { %v934_v42 = vadd.f32 %v925_v41, %v868_v10  ;;  %1591 = vmatpush3.bf16.msra.mxu0 %v1588_v49 }
 0x330   : > { %1593 = vmatprep.subr.bf16.mxu0 %v1592_v2 }
 0x331   : > { %1527 = vmatprep.mubr.msk.f32.mxu0 %vm941_vm6, %v934_v42  ;;  %v1264_v18 = vpop.permute.xlu1 %1263 }
 0x332   : > { %1528 = vmatmul.mubr.msk.f32.gmra.mrb[6].mxu0 %vm941_vm6, %v935_v43  ;;  %v1262_v17 = vpop.permute.xlu0 %1261 }
 0x333   : > { %1595 = vmatpush3.bf16.msra.mxu0 %v1592_v2 }
 0x335   : > { %v1266_v21 = vpop.permute.xlu1 %1265 }
 0x336   : > { %v1278_v20 = vpop.permute.xlu0 %1277 }
 0x339   : > { %v1268_v30 = vpop.permute.xlu1 %1267 }
 0x33a   : > { %v1280_v28 = vpop.permute.xlu0 %1279 }
 0x33d   : > { %v1284_v40 = vpop.permute.xlu1 %1283 }
 0x33e   : > { %v1282_v38 = vpop.permute.xlu0 %1281 }
 0x401   : > { %v1526_v52 = vpop.f32.mrb[4].mxu0 }
 0x402   : > { %v1026_v53 = vadd.f32 %v1526_v52, %v940_v51  ;;  %v1020_v54 = vpop.f32.mrb[5].mxu0 }
 0x403   : > { %v1021_v55 = vadd.f32 %v1020_v54, %v940_v51 }
 0x404   : > { %v1040_v58 = vmax.f32 %v1026_v53, 0.0 }
 0x405   : > { %v1039_v56 = vmax.f32 %v1021_v55, 0.0  ;;  %v1529_v57 = vpop.f32.mrb[6].mxu0 }
 0x406   : > { %v1036_v59 = vadd.f32 %v1529_v57, %v940_v51  ;;  %v1030_v60 = vpop.f32.mrb[7].mxu0 }
 0x407   : > { %v1031_v61 = vadd.f32 %v1030_v60, %v940_v51  ;;  %1538 = vmatprep.mubr.msk.f32.mxu1 %vm669_vm5, %v1039_v56 }
 0x408   : > { %1539 = vmatmul.mubr.msk.f32.vlgmr.msra.gmra.mrb[8].mxu1 %vm669_vm5, %v1040_v58  ;;  %v1042_v63 = vmax.f32 %v1036_v59, 0.0 }
 0x409   : > { %v1041_v62 = vmax.f32 %v1031_v61, 0.0 }
 0x40b   : > { %1541 = vmatprep.mubr.msk.f32.mxu1 %vm669_vm5, %v1041_v62 }
 0x40c   : > { %1542 = vmatmul.mubr.msk.f32.gmra.mrb[10].mxu1 %vm669_vm5, %v1042_v63 }
 0x4db   : > { %v1540_v5 = vpop.f32.mrb[8].mxu1 }
 0x4dc   : > { %v1135_v6 = vadd.f32 %v1540_v5, %v1050_v4  ;;  %v1129_v7 = vpop.f32.mrb[9].mxu1 }
 0x4dd   : > { %v1130_v8 = vadd.f32 %v1129_v7, %v1050_v4 }
 0x4de   : > { %v1149_v11 = vmax.f32 %v1135_v6, 0.0 }
 0x4df   : > { %v1148_v9 = vmax.f32 %v1130_v8, 0.0  ;;  %v1543_v10 = vpop.f32.mrb[10].mxu1 }
 0x4e0   : > { %v1145_v12 = vadd.f32 %v1543_v10, %v1050_v4  ;;  %v1139_v13 = vpop.f32.mrb[11].mxu1 }
 0x4e1   : > { %v1140_v14 = vadd.f32 %v1139_v13, %v1050_v4  ;;  %1552 = vmatprep.mubr.msk.f32.mxu0 %vm669_vm5, %v1148_v9 }
 0x4e2   : > { %1553 = vmatmul.mubr.msk.f32.vlgmr.msra.gmra.mrb[8].mxu0 %vm669_vm5, %v1149_v11  ;;  %v1151_v16 = vmax.f32 %v1145_v12, 0.0 }
 0x4e3   : > { %v1150_v15 = vmax.f32 %v1140_v14, 0.0 }
 0x4e5   : > { %1555 = vmatprep.mubr.msk.f32.mxu0 %vm669_vm5, %v1150_v15 }
 0x4e6   : > { %1556 = vmatmul.mubr.msk.f32.gmra.mrb[10].mxu0 %vm669_vm5, %v1151_v16 }
 0x5b5   : > { %v1554_v24 = vpop.f32.mrb[8].mxu0 }
 0x5b6   : > { %v1244_v26 = vadd.f32 %v1554_v24, %v1159_v22  ;;  %v1238_v27 = vpop.f32.mrb[9].mxu0 }
 0x5b7   : > { %v1239_v29 = vadd.f32 %v1238_v27, %v1159_v22 }
 0x5b8   : > { %v1291_v31 = vsel %vm1289_vm7, %v1244_v26, %v1264_v18 }
 0x5b9   : > { %v1290_v23 = vsel %vm1289_vm7, %v1239_v29, %v1262_v17  ;;  %v1557_v32 = vpop.f32.mrb[10].mxu0  ;;  %v1296_v35 = vsel %vm1294_vm8, %v1291_v31, %v1280_v28 }
 0x5ba   : > { %v1295_v33 = vsel %vm1294_vm8, %v1290_v23, %v1278_v20  ;;  %v1254_v25 = vadd.f32 %v1557_v32, %v1159_v22  ;;  %v1248_v34 = vpop.f32.mrb[11].mxu0  ;;  %1300 = vst.msk [vmem:[%s432_s25 + $0x8] sm:$0xff] %vm669_vm5, %v1296_v35 }
 0x5bb   : > { %1299 = vst.msk [vmem:[%s432_s25] sm:$0xff] %vm669_vm5, %v1295_v33  ;;  %v1249_v36 = vadd.f32 %v1248_v34, %v1159_v22 }
 0x5bc   : > { %v1293_v37 = vsel %vm1289_vm7, %v1254_v25, %v1268_v30 }
 0x5bd   : > { %v1292_v39 = vsel %vm1289_vm7, %v1249_v36, %v1266_v21  ;;  %v1298_v42 = vsel %vm1294_vm8, %v1293_v37, %v1284_v40 }
 0x5be   : > { %v1297_v41 = vsel %vm1294_vm8, %v1292_v39, %v1282_v38  ;;  %1302 = vst.msk [vmem:[%s432_s25 + $0x18] sm:$0xff] %vm669_vm5, %v1298_v42 }
 0x5bf   : > { %1301 = vst.msk [vmem:[%s432_s25 + $0x10] sm:$0xff] %vm669_vm5, %v1297_v41 }
 0x5c0 PF: > { %s21_s17 = sadd.s32 1, %s1626_s17  }
 0x5c1   : > { %p18_p4 = scmp.ge.s32.totalorder %s21_s17, 4  }
 0x5c3   :  { %20 = sbr.rel (!%p18_p4) target bundleno = 1 (0x1), region = 100 }

</bundles_post_ra>
